<compile_context>
chip_gen: v6e
topology: v6e:2x2x1
jax: 0.10.0
libtpu: 0.0.40
codegen_flags: <defaults>
</compile_context>

<pallas_src>
import jax
import jax.numpy as jnp
from jax.experimental import pallas as pl
from jax.experimental.pallas import tpu as pltpu

# ---- small-scale config consistent with the module's forward ---------------
SEQ = 8                      # orig: 512
HIDDEN = 32                  # orig: 768
DIM = SEQ * HIDDEN           # 256   (orig: 768*512)
CHANNELS = 8                 # orig: 64
KERNEL = 16                  # orig: 64
LOUT = DIM - (KERNEL - 1)    # 241   (same formula as the module's self.lout)
VOCAB = 128
BATCH = 2

OUT_LANES = 128              # lane-dense output width
MAX_TILE_D = 16 * 1024       # cap on per-step DIM tile (f32 lanes): 8 rows x 16K
                             # x 4 B x 2 bufs = 1 MiB, well under scoped VMEM on
                             # all of v5e/v6e/v7x even at the real module dims.


def _round_up(n, m):
    return ((n + m - 1) // m) * m


def _pick_tile_d(dim):
    """Largest multiple-of-128 divisor of `dim` that is <= MAX_TILE_D."""
    assert dim % 128 == 0, "DIM must be lane-aligned (multiple of 128)"
    best = 128
    t = 128
    cap = min(dim, MAX_TILE_D)
    while t <= cap:
        if dim % t == 0:
            best = t
        t += 128
    return best


# ---------------------------- Pallas kernel ---------------------------------
def accm_head_kernel(x_ref, w_ref, b_ref, o_ref, acc_ref):
    # x_ref  : (B_PAD, TILE_D)     VMEM  batch rows, one DIM tile
    # w_ref  : (1, TILE_D)         VMEM  folded conv+linear effective-weight tile
    # b_ref  : (1,)                SMEM  folded scalar bias
    # o_ref  : (B_PAD, OUT_LANES)  VMEM  lane-dense output slab (resident across k)
    # acc_ref: (B_PAD, 1)          VMEM  running per-row dot product
    k = pl.program_id(0)

    @pl.when(k == 0)
    def _():
        acc_ref[...] = jnp.zeros_like(acc_ref)

    # VPU multiply + XLU cross-lane reduce; kernel is HBM-load bound, both
    # units have slack.
    acc_ref[...] += jnp.sum(x_ref[...] * w_ref[...], axis=-1, keepdims=True)

    @pl.when(k == pl.num_programs(0) - 1)
    def _():
        probs = jax.nn.sigmoid(acc_ref[...] + b_ref[0])          # (B_PAD, 1)
        o_ref[...] = jnp.broadcast_to(probs, o_ref.shape)        # unmasked vst


def _fold_conv_linear(w_conv, b_conv, w_lin, b_lin):
    """Fold Conv1d -> flatten(c-major) -> Linear into (w_eff, b_eff).

    logit[b] = sum_{c,t} w_lin_c[c,t] * (sum_k w_conv[c,k]*x[b,t+k] + b_conv[c])
               + b_lin
             = sum_d x[b,d] * w_eff[d] + b_eff
    Exact because Dropout(0.2) is identity in eval/inference mode.
    Trace-time-only prep (tiny loop over KERNEL taps).
    """
    w_lin_c = w_lin.reshape(CHANNELS, LOUT)        # matches torch .view order
    w_eff = jnp.zeros((DIM,), jnp.float32)
    for k in range(KERNEL):
        contrib = w_conv[:, k] @ w_lin_c           # (LOUT,)
        w_eff = w_eff.at[k:k + LOUT].add(contrib)
    b_eff = b_lin[0] + jnp.sum(w_lin_c * b_conv[:, None])
    return w_eff, b_eff


def accm_head(x, w_conv, b_conv, w_lin, b_lin):
    """x: (B, 1, DIM) float32 -> (B, 1) sigmoid outputs."""
    B = x.shape[0]
    w_eff, b_eff = _fold_conv_linear(w_conv, b_conv, w_lin, b_lin)

    b_pad = max(8, _round_up(B, 8))                # sublane-aligned batch block
    xf = x.reshape(B, DIM)
    x_pad = jnp.zeros((b_pad, DIM), jnp.float32).at[:B, :].set(xf)

    tile_d = _pick_tile_d(DIM)                     # == DIM at demo shapes
    grid = (DIM // tile_d,)

    out = pl.pallas_call(
        accm_head_kernel,
        out_shape=jax.ShapeDtypeStruct((b_pad, OUT_LANES), jnp.float32),
        grid=grid,
        in_specs=[
            pl.BlockSpec((b_pad, tile_d), lambda k: (0, k)),
            pl.BlockSpec((1, tile_d), lambda k: (0, k)),
            pl.BlockSpec(memory_space=pltpu.MemorySpace.SMEM),   # scalar bias
        ],
        out_specs=pl.BlockSpec((b_pad, OUT_LANES), lambda k: (0, 0)),
        scratch_shapes=[pltpu.VMEM((b_pad, 1), jnp.float32)],
        compiler_params=pltpu.CompilerParams(
            dimension_semantics=("arbitrary",)),   # DIM is a reduction axis
    )(x_pad, w_eff.reshape(1, DIM), b_eff.reshape(1))
    return out[:B, 0:1]


# ----------------------- plain-JAX glue (BERT stub, loss) -------------------
def bert_last_hidden_state(input_ids, emb, pos, ln_g, ln_b):
    # TODO(synk): pretrained BERT encoder not translated; deterministic
    # embedding + LayerNorm stub producing hidden_states[-1] of shape
    # (B, SEQ, HIDDEN).
    h = emb[input_ids] + pos[None, :, :]
    mu = jnp.mean(h, axis=-1, keepdims=True)
    var = jnp.var(h, axis=-1, keepdims=True)
    return (h - mu) / jnp.sqrt(var + 1e-12) * ln_g + ln_b


def accm_bert_forward(params, input_ids, labels=None):
    h = bert_last_hidden_state(input_ids, params["emb"], params["pos"],
                               params["ln_g"], params["ln_b"])
    x = h.reshape(-1, 1, DIM)                    # == torch .view(-1, 1, dim)
    probs = accm_head(x, params["w_conv"], params["b_conv"],
                      params["w_lin"], params["b_lin"])
    loss = None
    if labels is not None:                       # nn.BCELoss() (mean reduction)
        y = labels.reshape(-1, 1).astype(jnp.float32)
        p = jnp.clip(probs, 1e-7, 1.0 - 1e-7)
        loss = -jnp.mean(y * jnp.log(p) + (1.0 - y) * jnp.log(1.0 - p))
    return {"logits": probs, "loss": loss}


def reference_head(x, w_conv, b_conv, w_lin, b_lin):
    """Pure-JAX reference for the Pallas head (un-folded im2col formulation)."""
    xf = x[:, 0, :]                                              # (B, DIM)
    idx = jnp.arange(LOUT)[:, None] + jnp.arange(KERNEL)[None, :]
    col = xf[:, idx]                                             # (B, LOUT, KERNEL)
    conv = jnp.einsum("blk,ck->bcl", col, w_conv) + b_conv[None, :, None]
    flat = conv.reshape(xf.shape[0], CHANNELS * LOUT)            # c-major flatten
    return jax.nn.sigmoid(flat @ w_lin.T + b_lin)                # (B, 1)


# ------------------------------------ main ----------------------------------
if __name__ == "__main__":
    key = jax.random.PRNGKey(0)
    ks = jax.random.split(key, 8)
    params = {
        "emb":   0.02 * jax.random.normal(ks[0], (VOCAB, HIDDEN), jnp.float32),
        "pos":   0.02 * jax.random.normal(ks[1], (SEQ, HIDDEN), jnp.float32),
        "ln_g":  jnp.ones((HIDDEN,), jnp.float32),
        "ln_b":  jnp.zeros((HIDDEN,), jnp.float32),
        "w_conv": (1.0 / KERNEL) ** 0.5
                  * jax.random.normal(ks[2], (CHANNELS, KERNEL), jnp.float32),
        "b_conv": 0.01 * jax.random.normal(ks[3], (CHANNELS,), jnp.float32),
        "w_lin": (1.0 / (LOUT * CHANNELS)) ** 0.5
                 * jax.random.normal(ks[4], (1, LOUT * CHANNELS), jnp.float32),
        "b_lin": 0.01 * jax.random.normal(ks[5], (1,), jnp.float32),
    }
    input_ids = jax.random.randint(ks[6], (BATCH, SEQ), 0, VOCAB)
    labels = jax.random.randint(ks[7], (BATCH,), 0, 2)

    fwd = jax.jit(accm_bert_forward)             # fuse glue + trace-time fold
    out = fwd(params, input_ids, labels=labels)
    jax.block_until_ready(out["logits"])
    jax.block_until_ready(out["loss"])

    # sanity check the Pallas head against the pure-JAX (un-folded) reference
    h = bert_last_hidden_state(input_ids, params["emb"], params["pos"],
                               params["ln_g"], params["ln_b"])
    x3 = h.reshape(-1, 1, DIM)
    ref = reference_head(x3, params["w_conv"], params["b_conv"],
                         params["w_lin"], params["b_lin"])
    assert out["logits"].shape == (BATCH, 1)
    assert jnp.allclose(out["logits"], ref, atol=1e-4, rtol=1e-4), (out["logits"], ref)

    print("KERNEL_OK")
</pallas_src>

<mosaic_0001>
module attributes {stable_mosaic.version = 11 : i64} {
  func.func @accm_head_kernel(%arg0: i32, %arg1: memref<8x256xf32, #tpu.memory_space<vmem>>, %arg2: memref<1x256xf32, #tpu.memory_space<vmem>>, %arg3: memref<1xf32, #tpu.memory_space<smem>>, %arg4: memref<8x128xf32, #tpu.memory_space<vmem>>, %arg5: memref<8x1xf32, #tpu.memory_space<vmem>>) attributes {dimension_semantics = [#tpu.dimension_semantics<arbitrary>], iteration_bounds = array<i64: 1>, scalar_prefetch = 0 : i64, scratch_operands = 1 : i64, tpu.core_type = #tpu.core_type<tc>, window_params = [{transform_indices = @transform_0, window_bounds = array<i64: 8, 256>}, {transform_indices = @transform_1, window_bounds = array<i64: 1, 256>}, {transform_indices = @transform_2, window_bounds = array<i64: 1>}, {pipeline_mode = #tpu.pipeline_mode<synchronous>, transform_indices = @transform_3, window_bounds = array<i64: 8, 128>}]} {
    %c0_i32 = arith.constant 0 : i32
    %0 = arith.cmpi eq, %arg0, %c0_i32 : i32
    %1 = arith.extui %0 : i1 to i32
    %c0_i32_0 = arith.constant 0 : i32
    %2 = arith.cmpi ne, %1, %c0_i32_0 : i32
    scf.if %2 {
      %cst_10 = arith.constant 0.000000e+00 : f32
      %15 = vector.broadcast %cst_10 : f32 to vector<8x1xf32>
      %c0_11 = arith.constant 0 : index
      %c0_12 = arith.constant 0 : index
      %16 = vector.load %arg5[%c0_11, %c0_12] : memref<8x1xf32, #tpu.memory_space<vmem>>, vector<8x1xf32>
      tpu.vector_store %arg5[%c0_11, %c0_12], %15 {strides = array<i32>} : memref<8x1xf32, #tpu.memory_space<vmem>>, vector<8x1xf32>,
    } else {
    }
    %c0 = arith.constant 0 : index
    %c0_1 = arith.constant 0 : index
    %3 = vector.load %arg5[%c0, %c0_1] : memref<8x1xf32, #tpu.memory_space<vmem>>, vector<8x1xf32>
    %c0_2 = arith.constant 0 : index
    %c0_3 = arith.constant 0 : index
    %4 = vector.load %arg1[%c0_2, %c0_3] : memref<8x256xf32, #tpu.memory_space<vmem>>, vector<8x256xf32>
    %c0_4 = arith.constant 0 : index
    %c0_5 = arith.constant 0 : index
    %5 = vector.load %arg2[%c0_4, %c0_5] : memref<1x256xf32, #tpu.memory_space<vmem>>, vector<1x256xf32>
    %6 = vector.broadcast %5 : vector<1x256xf32> to vector<8x256xf32>
    %7 = arith.mulf %4, %6 : vector<8x256xf32>
    %cst = arith.constant dense<0.000000e+00> : vector<8xf32>
    %8 = vector.multi_reduction <add>, %7, %cst [1] : vector<8x256xf32> to vector<8xf32>
    %9 = vector.shape_cast %8 : vector<8xf32> to vector<8x1xf32>
    %10 = arith.addf %3, %9 : vector<8x1xf32>
    %c0_6 = arith.constant 0 : index
    %c0_7 = arith.constant 0 : index
    %11 = vector.load %arg5[%c0_6, %c0_7] : memref<8x1xf32, #tpu.memory_space<vmem>>, vector<8x1xf32>
    tpu.vector_store %arg5[%c0_6, %c0_7], %10 {strides = array<i32>} : memref<8x1xf32, #tpu.memory_space<vmem>>, vector<8x1xf32>,
    %c0_i32_8 = arith.constant 0 : i32
    %12 = arith.cmpi eq, %arg0, %c0_i32_8 : i32
    %13 = arith.extui %12 : i1 to i32
    %c0_i32_9 = arith.constant 0 : i32
    %14 = arith.cmpi ne, %13, %c0_i32_9 : i32
    scf.if %14 {
      %c0_10 = arith.constant 0 : index
      %c0_11 = arith.constant 0 : index
      %15 = vector.load %arg5[%c0_10, %c0_11] : memref<8x1xf32, #tpu.memory_space<vmem>>, vector<8x1xf32>
      %c0_12 = arith.constant 0 : index
      %16 = memref.load %arg3[%c0_12] : memref<1xf32, #tpu.memory_space<smem>>
      %17 = vector.broadcast %16 : f32 to vector<8x1xf32>
      %18 = arith.addf %15, %17 : vector<8x1xf32>
      %19 = arith.negf %18 : vector<8x1xf32>
      %20 = math.exp %19 : vector<8x1xf32>
      %cst_13 = arith.constant 1.000000e+00 : f32
      %21 = vector.broadcast %cst_13 : f32 to vector<8x1xf32>
      %22 = arith.addf %21, %20 : vector<8x1xf32>
      %23 = arith.divf %21, %22 : vector<8x1xf32>
      %24 = vector.shape_cast %23 : vector<8x1xf32> to vector<8x1xf32>
      %25 = vector.broadcast %24 : vector<8x1xf32> to vector<8x128xf32>
      %c0_14 = arith.constant 0 : index
      %c0_15 = arith.constant 0 : index
      %26 = vector.load %arg4[%c0_14, %c0_15] : memref<8x128xf32, #tpu.memory_space<vmem>>, vector<8x128xf32>
      tpu.vector_store %arg4[%c0_14, %c0_15], %25 {strides = array<i32>} : memref<8x128xf32, #tpu.memory_space<vmem>>, vector<8x128xf32>,
    } else {
    }
    return
  }
  func.func @transform_0(%arg0: i32) -> (i32, i32) {
    %c0_i32 = arith.constant 0 : i32
    %c0_i32_0 = arith.constant 0 : i32
    return %c0_i32, %arg0 : i32, i32
  }
  func.func @transform_1(%arg0: i32) -> (i32, i32) {
    %c0_i32 = arith.constant 0 : i32
    %c0_i32_0 = arith.constant 0 : i32
    return %c0_i32, %arg0 : i32, i32
  }
  func.func @transform_2(%arg0: i32) -> i32 {
    %c0_i32 = arith.constant 0 : i32
    %c0_i32_0 = arith.constant 0 : i32
    return %c0_i32 : i32
  }
  func.func @transform_3(%arg0: i32) -> (i32, i32) {
    %c0_i32 = arith.constant 0 : i32
    %c0_i32_0 = arith.constant 0 : i32
    %c0_i32_1 = arith.constant 0 : i32
    return %c0_i32, %c0_i32_0 : i32, i32
  }
}

</mosaic_0001>

<bundles_post_ra>
// kernel: accm_bert_forward.1
= control target key start
LH: loop header
LB: loop body
LE: loop exit
PB: predicated region body
PF: predicated region fallthrough
CT: control target
= control target key end

     0   :  { %v26_v0 = vlaneseq  ;;  %vm19_vm0 = vcmask 7168   ;;  %v75_v1 = vmov 0.0   ;;  %v76_v13 = vmov 0   ;;  %s114_s1 = inlined_call_operand.vmem [shape: f32[1,256], index: 1, kind: input, shape index: {}]   ;;  %s115_s0 = inlined_call_operand.vmem [shape: f32[8,256], index: 0, kind: input, shape index: {}]   ;;  %s116_s2 = inlined_call_operand.<no memory space> [shape: f32[1], index: 2, kind: input, shape index: {}]   ;;  %s117_s3 = inlined_call_operand.vmem [shape: f32[8,128], index: 3, kind: output, shape index: {}]  }
   0x1   :  { %20 = vst.msk [vmem:[#allocation2] sm:$0xff] %vm19_vm0, %v75_v1  ;;  %v24_v3 = vld [vmem:[%s114_s1] sm:$0x3]  ;;  %v23_v7 = vld [vmem:[%s115_s0 + $0x8] sm:$0xff]  ;;  %70 = vset.pattern.permute.xlu0 %v76_v13  ;;  %v49_v17 = vstv %s116_s2 }
   0x2   :  { %v27_v2 = vshrl.u32 %v26_v0, 7  ;;  %v22_v6 = vld [vmem:[%s115_s0] sm:$0xff] }
   0x4   :  { %v28_v4 = vsub.s32 0, %v27_v2  ;;  %v32_v5 = vsub.s32 1, %v27_v2 }
   0x6   :  { %v29_v8 = vrot.slane %v24_v3, %v28_v4  ;;  %v33_v9 = vrot.slane %v24_v3, %v32_v5 }
   0x8   :  { %v36_v10 = vmul.f32 %v29_v8, %v22_v6  ;;  %v37_v11 = vmul.f32 %v33_v9, %v23_v7  ;;  %v21_v14 = vld [vmem:[#allocation2] sm:$0xff] }
   0xa   :  { %v38_v12 = vadd.f32 %v37_v11, %v36_v10 }
   0xc   :  { %39 = vadd.xlane.f32.xlu0 %v38_v12 }
  0x95   :  { %v40_v15 = vpop.xlane.xlu0 %39 }
  0x96   :  { %v41_v16 = vadd.f32 %v40_v15, %v21_v14 }
  0x98   :  { %43 = vst.msk [vmem:[#allocation2] sm:$0xff] %vm19_vm0, %v41_v16 }
  0x9f   :  { %v47_v18 = vld [vmem:[#allocation2] sm:$0xff] }
  0xa0   :  { %v50_v19 = vadd.f32 %v49_v17, %v47_v18 }
  0xa2   :  { %v67_v20 = vmul.f32 -1.442695, %v50_v19 }
  0xa4   :  { %71 = vpow2.f32 %v67_v20 }
  0xb1   :  { %v72_v21 = vpop.eup %71 }
  0xb2   :  { %v54_v22 = vadd.f32 1.0, %v72_v21 }
  0xb4   :  { %73 = vrcp.f32 %v54_v22 }
  0xc1   :  { %v74_v23 = vpop.eup %73 }
  0xc2   :  { %59 = vperm.xlu0 %70, %v74_v23  }
 0x13d   :  { %v60_v24 = vpop.permute.xlu0 %59 }
 0x13e   :  { %62 = vst [vmem:[%s117_s3] sm:$0xff] %v60_v24 }

</bundles_post_ra>
